<compile_context>
chip_gen: v7x
topology: tpu7x:2x2x1
jax: 0.10.0
libtpu: 0.0.40
codegen_flags: <defaults>
</compile_context>

<pallas_src>
import functools

import jax
import jax.numpy as jnp
from jax.experimental import pallas as pl
from jax.experimental.pallas import tpu as pltpu


def _ce_kernel(logits_ref, labels_ref, out_ref, *, n_rows, block_n):
    """Per-sample cross entropy for one block of rows.

    logits_ref: (block_n, C) native dtype
    labels_ref: (block_n, 1) int32
    out_ref:    (block_n, 1) float32
    """
    i = pl.program_id(0)

    logits = logits_ref[...].astype(jnp.float32)              # (TN, C)
    labels = labels_ref[...]                                   # (TN, 1)

    # Numerically-stable log-sum-exp; reuse shifted logits for the gather.
    m = jnp.max(logits, axis=-1, keepdims=True)                # (TN, 1)
    shifted = logits - m                                        # (TN, C)
    sum_exp = jnp.sum(jnp.exp(shifted), axis=-1, keepdims=True)

    # Gather shifted[r, label_r] via an iota/compare mask (VPU/XLU only).
    class_ids = jax.lax.broadcasted_iota(jnp.int32, shifted.shape, 1)
    picked_shifted = jnp.sum(
        jnp.where(class_ids == labels, shifted, 0.0),
        axis=-1, keepdims=True)                                 # (TN, 1)

    loss = jnp.log(sum_exp) - picked_shifted                    # (TN, 1)

    # Mask rows past the true batch size (the last block may read clamped /
    # unspecified padding; its values must not leak into the output).
    row_ids = i * block_n + jax.lax.broadcasted_iota(jnp.int32, loss.shape, 0)
    out_ref[...] = jnp.where(row_ids < n_rows, loss, 0.0)


def _pick_block_n(n, c, itemsize):
    """Largest row tile keeping the double-buffered working set ~<= 8 MiB."""
    # Sublane packing: f32 -> 8 rows per vreg, bf16 -> 16, int8/fp8 -> 32.
    sub = 8 if itemsize >= 4 else (16 if itemsize == 2 else 32)
    # Per row: double-buffered native-dtype logits + f32 working copy inside
    # the kernel + the lane-padded (block, 1) label/output blocks.
    per_row = 2 * c * itemsize + 4 * c + 2048
    block = (8 * 1024 * 1024) // max(per_row, 1)
    block = max(sub, min(block, 2048))
    block = (block // sub) * sub
    n_cap = -(-n // sub) * sub          # round N up to the sublane multiple
    return max(sub, min(block, n_cap))


# TODO(synk): for vocab-scale C, tile the class axis with an online logsumexp
# instead of keeping a full-C row block in VMEM (block_n only shrinks here).
def _ce_per_sample(cls_score, label, *, block_n):
    n, c = cls_score.shape
    n_blocks = pl.cdiv(n, block_n)
    n_pad = n_blocks * block_n
    labels2 = label.astype(jnp.int32).reshape(n, 1)

    kernel = functools.partial(_ce_kernel, n_rows=n, block_n=block_n)
    out = pl.pallas_call(
        kernel,
        out_shape=jax.ShapeDtypeStruct((n_pad, 1), jnp.float32),
        grid_spec=pltpu.PrefetchScalarGridSpec(
            num_scalar_prefetch=0,
            grid=(n_blocks,),
            in_specs=[
                pl.BlockSpec((block_n, c), lambda i: (i, 0)),
                pl.BlockSpec((block_n, 1), lambda i: (i, 0)),
            ],
            out_specs=pl.BlockSpec((block_n, 1), lambda i: (i, 0)),
        ),
        compiler_params=pltpu.CompilerParams(
            dimension_semantics=("parallel",)),
    )(cls_score, labels2)
    return out[:n, 0]


class CrossEntropyLoss:
    """JAX/Pallas equivalent of the PyTorch CrossEntropyLoss module."""

    def __init__(self, loss_weight=1.0):
        self.loss_weight = float(loss_weight)

    @functools.partial(jax.jit, static_argnums=(0, 4, 5))
    def _call(self, cls_score, label, weight, avg_factor, block_n):
        n = cls_score.shape[0]
        loss = _ce_per_sample(cls_score, label, block_n=block_n)   # (N,) f32
        # TODO(synk): F.cross_entropy's ignore_index (-100) semantics are not
        # handled; the module never passes it and labels are assumed valid.
        if weight is not None:
            loss = loss * weight.astype(jnp.float32).reshape(n)
        loss = loss * self.loss_weight
        if avg_factor:              # truthiness check, matching the module
            return jnp.sum(loss) / jnp.float32(avg_factor)
        return jnp.mean(loss)

    def __call__(self, cls_score, label, weight=None, avg_factor=None,
                 block_n=None):
        if block_n is None:
            n, c = cls_score.shape
            block_n = _pick_block_n(n, c, jnp.dtype(cls_score.dtype).itemsize)
        return self._call(cls_score, label, weight, avg_factor, block_n)


def _reference(cls_score, label, weight, avg_factor, loss_weight):
    logp = jax.nn.log_softmax(cls_score.astype(jnp.float32), axis=-1)
    loss = -jnp.take_along_axis(logp, label[:, None].astype(jnp.int32),
                                axis=-1)[:, 0]
    if weight is not None:
        loss = loss * weight.astype(jnp.float32)
    loss = loss * loss_weight
    if avg_factor:
        return loss.sum() / avg_factor
    return loss.mean()


if __name__ == "__main__":
    key = jax.random.PRNGKey(0)
    k1, k2, k3, k4, k5, k6 = jax.random.split(key, 6)

    loss_mod = CrossEntropyLoss(loss_weight=1.5)

    # 1) f32 logits, plain mean (single auto-sized block).
    N, C = 64, 16
    cls_score = jax.random.normal(k1, (N, C), dtype=jnp.float32)
    label = jax.random.randint(k2, (N,), 0, C, dtype=jnp.int32)
    out1 = loss_mod(cls_score, label)
    ref1 = _reference(cls_score, label, None, None, 1.5)

    # 2) f32 logits, sample weights + avg_factor, multi-block grid with a
    #    ragged last block (N not a multiple of block_n).
    N2, C2 = 100, 24
    cls2 = jax.random.normal(k3, (N2, C2), dtype=jnp.float32)
    lab2 = jax.random.randint(k4, (N2,), 0, C2, dtype=jnp.int32)
    w2 = jax.random.uniform(k5, (N2,), dtype=jnp.float32)
    out2 = loss_mod(cls2, lab2, weight=w2, avg_factor=10.0, block_n=32)
    ref2 = _reference(cls2, lab2, w2, 10.0, 1.5)

    # 3) bf16 logits streamed natively (no wrapper cast), with weights.
    cls3 = jax.random.normal(k6, (N, C), dtype=jnp.float32).astype(jnp.bfloat16)
    w3 = jax.random.uniform(k5, (N,), dtype=jnp.float32)
    out3 = loss_mod(cls3, label, weight=w3)
    ref3 = _reference(cls3, label, w3, None, 1.5)

    jax.block_until_ready((out1, out2, out3))

    assert jnp.allclose(out1, ref1, rtol=1e-5, atol=1e-5), (out1, ref1)
    assert jnp.allclose(out2, ref2, rtol=1e-5, atol=1e-5), (out2, ref2)
    assert jnp.allclose(out3, ref3, rtol=1e-4, atol=1e-4), (out3, ref3)

    print("KERNEL_OK")
</pallas_src>

<mosaic_0001>
module attributes {stable_mosaic.version = 11 : i64} {
  func.func @_ce_kernel(%arg0: i32, %arg1: memref<64x16xf32, #tpu.memory_space<vmem>>, %arg2: memref<64x1xi32, #tpu.memory_space<vmem>>, %arg3: memref<64x1xf32, #tpu.memory_space<vmem>>) attributes {dimension_semantics = [#tpu.dimension_semantics<parallel>], iteration_bounds = array<i64: 1>, scalar_prefetch = 0 : i64, scratch_operands = 0 : i64, tpu.core_type = #tpu.core_type<tc>, window_params = [{transform_indices = @transform_0, window_bounds = array<i64: 64, 16>}, {transform_indices = @transform_1, window_bounds = array<i64: 64, 1>}, {transform_indices = @transform_2, window_bounds = array<i64: 64, 1>}]} {
    %c0 = arith.constant 0 : index
    %c0_0 = arith.constant 0 : index
    %0 = vector.load %arg1[%c0, %c0_0] : memref<64x16xf32, #tpu.memory_space<vmem>>, vector<64x16xf32>
    %c0_1 = arith.constant 0 : index
    %c0_2 = arith.constant 0 : index
    %1 = vector.load %arg2[%c0_1, %c0_2] : memref<64x1xi32, #tpu.memory_space<vmem>>, vector<64x1xi32>
    %cst = arith.constant dense<0xFF800000> : vector<64xf32>
    %2 = vector.multi_reduction <maximumf>, %0, %cst [1] : vector<64x16xf32> to vector<64xf32>
    %3 = vector.shape_cast %2 : vector<64xf32> to vector<64x1xf32>
    %4 = vector.broadcast %3 : vector<64x1xf32> to vector<64x16xf32>
    %5 = arith.subf %0, %4 : vector<64x16xf32>
    %6 = math.exp %5 : vector<64x16xf32>
    %cst_3 = arith.constant dense<0.000000e+00> : vector<64xf32>
    %7 = vector.multi_reduction <add>, %6, %cst_3 [1] : vector<64x16xf32> to vector<64xf32>
    %8 = vector.shape_cast %7 : vector<64xf32> to vector<64x1xf32>
    %9 = tpu.iota {dimensions = array<i32: 1>} : vector<64x16xi32>
    %10 = vector.broadcast %1 : vector<64x1xi32> to vector<64x16xi32>
    %11 = arith.cmpi eq, %9, %10 : vector<64x16xi32>
    %cst_4 = arith.constant 0.000000e+00 : f32
    %12 = vector.broadcast %cst_4 : f32 to vector<64x16xf32>
    %13 = arith.select %11, %5, %12 : vector<64x16xi1>, vector<64x16xf32>
    %cst_5 = arith.constant dense<0.000000e+00> : vector<64xf32>
    %14 = vector.multi_reduction <add>, %13, %cst_5 [1] : vector<64x16xf32> to vector<64xf32>
    %15 = vector.shape_cast %14 : vector<64xf32> to vector<64x1xf32>
    %16 = math.log %8 : vector<64x1xf32>
    %17 = arith.subf %16, %15 : vector<64x1xf32>
    %c64_i32 = arith.constant 64 : i32
    %18 = arith.muli %arg0, %c64_i32 : i32
    %19 = tpu.iota {dimensions = array<i32: 0>} : vector<64x1xi32>
    %20 = vector.broadcast %18 : i32 to vector<64x1xi32>
    %21 = arith.addi %20, %19 : vector<64x1xi32>
    %c64_i32_6 = arith.constant 64 : i32
    %22 = vector.broadcast %c64_i32_6 : i32 to vector<64x1xi32>
    %23 = arith.cmpi slt, %21, %22 : vector<64x1xi32>
    %cst_7 = arith.constant 0.000000e+00 : f32
    %24 = vector.broadcast %cst_7 : f32 to vector<64x1xf32>
    %25 = arith.select %23, %17, %24 : vector<64x1xi1>, vector<64x1xf32>
    %c0_8 = arith.constant 0 : index
    %c0_9 = arith.constant 0 : index
    %26 = vector.load %arg3[%c0_8, %c0_9] : memref<64x1xf32, #tpu.memory_space<vmem>>, vector<64x1xf32>
    tpu.vector_store %arg3[%c0_8, %c0_9], %25 {strides = array<i32>} : memref<64x1xf32, #tpu.memory_space<vmem>>, vector<64x1xf32>,
    return
  }
  func.func @transform_0(%arg0: i32) -> (i32, i32) {
    %c0_i32 = arith.constant 0 : i32
    %c0_i32_0 = arith.constant 0 : i32
    return %arg0, %c0_i32 : i32, i32
  }
  func.func @transform_1(%arg0: i32) -> (i32, i32) {
    %c0_i32 = arith.constant 0 : i32
    %c0_i32_0 = arith.constant 0 : i32
    return %arg0, %c0_i32 : i32, i32
  }
  func.func @transform_2(%arg0: i32) -> (i32, i32) {
    %c0_i32 = arith.constant 0 : i32
    %c0_i32_0 = arith.constant 0 : i32
    return %arg0, %c0_i32 : i32, i32
  }
}

</mosaic_0001>

<bundles_post_ra>
// kernel: _call.1
= control target key start
LH: loop header
LB: loop body
LE: loop exit
PB: predicated region body
PF: predicated region fallthrough
CT: control target
= control target key end

     0   :  { %vm27_vm0 = vcmask 130048   ;;  %v273_v3 = vmov 0   ;;  %v100_v53 = vlaneseq  ;;  %vm225_vm9 = vcmask 7168   ;;  %s421_s0 = inlined_call_operand.vmem [shape: f32[64,16], index: 0, kind: input, shape index: {}]   ;;  %s422_s1 = inlined_call_operand.vmem [shape: s32[64,1], index: 1, kind: input, shape index: {}]   ;;  %s423_s2 = inlined_call_operand.vmem [shape: f32[64,1], index: 2, kind: output, shape index: {}]  }
   0x1   :  { %v13_v0 = vld [vmem:[%s421_s0 + $0x10] sm:$0xff]  ;;  %v11_v1 = vld [vmem:[%s421_s0] sm:$0xff]  ;;  %v14_v2 = vld [vmem:[%s421_s0 + $0x18] sm:$0xff]  ;;  %240 = vset.pattern.permute.xlu1 %v273_v3  ;;  %239 = vset.pattern.permute.xlu0 %v273_v3 }
   0x2   :  { %v34_v4 = vsel %vm27_vm0, %v13_v0, -inf  ;;  %v28_v5 = vsel %vm27_vm0, %v11_v1, -inf  ;;  %v12_v6 = vld [vmem:[%s421_s0 + $0x8] sm:$0xff]  ;;  %v37_v7 = vsel %vm27_vm0, %v14_v2, -inf  ;;  %v15_v10 = vld [vmem:[%s421_s0 + $0x20] sm:$0xff]  ;;  %v18_v13 = vld [vmem:[%s421_s0 + $0x38] sm:$0xff] }
   0x3   :  { %35 = vmax.xlane.f32.xlu1 %v34_v4  ;;  %29 = vmax.xlane.f32.xlu0 %v28_v5  ;;  %v31_v8 = vsel %vm27_vm0, %v12_v6, -inf  ;;  %v16_v9 = vld [vmem:[%s421_s0 + $0x28] sm:$0xff]  ;;  %v40_v12 = vsel %vm27_vm0, %v15_v10, -inf  ;;  %v17_v14 = vld [vmem:[%s421_s0 + $0x30] sm:$0xff]  ;;  %v49_v15 = vsel %vm27_vm0, %v18_v13, -inf  ;;  %v19_v19 = vld [vmem:[%s422_s1] sm:$0xff] }
   0x4   :  { %v43_v11 = vsel %vm27_vm0, %v16_v9, -inf  ;;  %v46_v16 = vsel %vm27_vm0, %v17_v14, -inf  ;;  %v20_v17 = vld [vmem:[%s422_s1 + $0x8] sm:$0xff]  ;;  %v21_v18 = vld [vmem:[%s422_s1 + $0x10] sm:$0xff]  ;;  %v22_v20 = vld [vmem:[%s422_s1 + $0x18] sm:$0xff]  ;;  %v101_v60 = vand.u32 127, %v100_v53 }
   0x5   :  { %v23_v21 = vld [vmem:[%s422_s1 + $0x20] sm:$0xff]  ;;  %v24_v22 = vld [vmem:[%s422_s1 + $0x28] sm:$0xff]  ;;  %v25_v23 = vld [vmem:[%s422_s1 + $0x30] sm:$0xff] }
   0x6   :  { %v26_v24 = vld [vmem:[%s422_s1 + $0x38] sm:$0xff] }
   0x7   :  { %38 = vmax.xlane.f32.xlu1 %v37_v7  ;;  %32 = vmax.xlane.f32.xlu0 %v31_v8 }
   0xb   :  { %44 = vmax.xlane.f32.xlu1 %v43_v11  ;;  %41 = vmax.xlane.f32.xlu0 %v40_v12 }
   0xf   :  { %50 = vmax.xlane.f32.xlu1 %v49_v15  ;;  %47 = vmax.xlane.f32.xlu0 %v46_v16 }
  0x20   :  { %106 = vperm.xlu1 %240, %v20_v17  }
  0x24   :  { %109 = vperm.xlu1 %240, %v21_v18  }
  0x25   :  { %103 = vperm.xlu0 %239, %v19_v19  }
  0x28   :  { %112 = vperm.xlu1 %240, %v22_v20  }
  0x2c   :  { %115 = vperm.xlu1 %240, %v23_v21  }
  0x30   :  { %118 = vperm.xlu1 %240, %v24_v22  }
  0x34   :  { %121 = vperm.xlu1 %240, %v25_v23  }
  0x38   :  { %124 = vperm.xlu1 %240, %v26_v24  }
  0x90   :  { %v36_v25 = vpop.xlane.xlu1 %35  ;;  %v30_v26 = vpop.xlane.xlu0 %29 }
  0x91   :  { %v345_v27 = vsub.f32 %v11_v1, %v30_v26  ;;  %v348_v29 = vsub.f32 %v13_v0, %v36_v25 }
  0x93   :  { %v60_v28 = vmul.f32 1.442695, %v345_v27  ;;  %v64_v36 = vmul.f32 1.442695, %v348_v29 }
  0x94   :  { %v39_v30 = vpop.xlane.xlu1 %38  ;;  %v33_v31 = vpop.xlane.xlu0 %32 }
  0x95   :  { %v350_v32 = vsub.f32 %v14_v2, %v39_v30  ;;  %v53_v33 = vsub.f32 %v12_v6, %v33_v31  ;;  %241 = vpow2.f32 %v60_v28 }
  0x97   :  { %v66_v34 = vmul.f32 1.442695, %v350_v32  ;;  %v62_v35 = vmul.f32 1.442695, %v53_v33 }
  0x98   :  { %v45_v37 = vpop.xlane.xlu1 %44  ;;  %v42_v38 = vpop.xlane.xlu0 %41 }
  0x99   :  { %243 = vpow2.f32 %v66_v34  ;;  %v354_v39 = vsub.f32 %v16_v9, %v45_v37  ;;  %v356_v40 = vsub.f32 %v15_v10, %v42_v38 }
  0x9a   :  { %245 = vpow2.f32 %v62_v35 }
  0x9b   :  { %v70_v41 = vmul.f32 1.442695, %v354_v39  ;;  %v68_v42 = vmul.f32 1.442695, %v356_v40  ;;  %247 = vpow2.f32 %v64_v36 }
  0x9c   :  { %v51_v43 = vpop.xlane.xlu1 %50  ;;  %v48_v44 = vpop.xlane.xlu0 %47 }
  0x9d   :  { %249 = vpow2.f32 %v70_v41  ;;  %v360_v45 = vsub.f32 %v18_v13, %v51_v43  ;;  %v362_v46 = vsub.f32 %v17_v14, %v48_v44 }
  0x9e   :  { %251 = vpow2.f32 %v68_v42 }
  0x9f   :  { %v74_v47 = vmul.f32 1.442695, %v360_v45  ;;  %v72_v48 = vmul.f32 1.442695, %v362_v46  ;;  %v242_v49 = vpop.eup %241 }
  0xa0   :  { %v107_v50 = vpop.permute.xlu1 %106  ;;  %v76_v51 = vsel %vm27_vm0, %v242_v49, 0.0 }
  0xa1   :  { %253 = vpow2.f32 %v74_v47  ;;  %77 = vadd.xlane.f32.xlu1 %v76_v51  ;;  %vm127_vm1 = vcmp.eq.s32.totalorder %v101_v60, %v107_v50 }
  0xa2   :  { %255 = vpow2.f32 %v72_v48  ;;  %v135_v7 = vsel %vm127_vm1, %v53_v33, 0.0 }
  0xa3   :  { %v244_v52 = vpop.eup %243  ;;  %v145_v10 = vsel %vm27_vm0, %v135_v7, 0.0 }
  0xa4   :  { %v246_v54 = vpop.eup %245  ;;  %v110_v55 = vpop.permute.xlu1 %109  ;;  %v85_v56 = vsel %vm27_vm0, %v244_v52, 0.0 }
  0xa5   :  { %v79_v57 = vsel %vm27_vm0, %v246_v54, 0.0  ;;  %v248_v58 = vpop.eup %247  ;;  %86 = vadd.xlane.f32.xlu1 %v85_v56  ;;  %v104_v4 = vpop.permute.xlu0 %103  ;;  %vm128_vm4 = vcmp.eq.s32.totalorder %v101_v60, %v110_v55 }
  0xa6   :  { %80 = vadd.xlane.f32.xlu0 %v79_v57  ;;  %v82_v0 = vsel %vm27_vm0, %v248_v58, 0.0  ;;  %vm126_vm2 = vcmp.eq.s32.totalorder %v101_v60, %v104_v4  ;;  %v136_v17 = vsel %vm128_vm4, %v348_v29, 0.0 }
  0xa7   :  { %v250_v59 = vpop.eup %249  ;;  %v134_v12 = vsel %vm126_vm2, %v345_v27, 0.0  ;;  %v148_v20 = vsel %vm27_vm0, %v136_v17, 0.0 }
  0xa8   :  { %v252_v61 = vpop.eup %251  ;;  %v113_v62 = vpop.permute.xlu1 %112  ;;  %v91_v63 = vsel %vm27_vm0, %v250_v59, 0.0  ;;  %v142_v15 = vsel %vm27_vm0, %v134_v12, 0.0 }
  0xa9   :  { %92 = vadd.xlane.f32.xlu1 %v91_v63  ;;  %v88_v2 = vsel %vm27_vm0, %v252_v61, 0.0  ;;  %vm129_vm3 = vcmp.eq.s32.totalorder %v101_v60, %v113_v62 }
  0xaa   :  { %83 = vadd.xlane.f32.xlu0 %v82_v0  ;;  %v137_v11 = vsel %vm129_vm3, %v350_v32, 0.0 }
  0xab   :  { %v254_v1 = vpop.eup %253  ;;  %v151_v14 = vsel %vm27_vm0, %v137_v11, 0.0 }
  0xac   :  { %v256_v3 = vpop.eup %255  ;;  %v116_v5 = vpop.permute.xlu1 %115  ;;  %v97_v6 = vsel %vm27_vm0, %v254_v1, 0.0 }
  0xad   :  { %98 = vadd.xlane.f32.xlu1 %v97_v6  ;;  %v94_v8 = vsel %vm27_vm0, %v256_v3, 0.0  ;;  %vm130_vm6 = vcmp.eq.s32.totalorder %v101_v60, %v116_v5 }
  0xae   :  { %89 = vadd.xlane.f32.xlu0 %v88_v2  ;;  %v138_v22 = vsel %vm130_vm6, %v356_v40, 0.0 }
  0xaf   :  { %v154_v24 = vsel %vm27_vm0, %v138_v22, 0.0 }
  0xb0   :  { %v119_v9 = vpop.permute.xlu1 %118 }
  0xb1   :  { %146 = vadd.xlane.f32.xlu1 %v145_v10  ;;  %vm131_vm5 = vcmp.eq.s32.totalorder %v101_v60, %v119_v9 }
  0xb2   :  { %95 = vadd.xlane.f32.xlu0 %v94_v8  ;;  %v139_v16 = vsel %vm131_vm5, %v354_v39, 0.0 }
  0xb3   :  { %v157_v19 = vsel %vm27_vm0, %v139_v16, 0.0 }
  0xb4   :  { %v122_v13 = vpop.permute.xlu1 %121 }
  0xb5   :  { %152 = vadd.xlane.f32.xlu1 %v151_v14  ;;  %vm132_vm8 = vcmp.eq.s32.totalorder %v101_v60, %v122_v13 }
  0xb6   :  { %143 = vadd.xlane.f32.xlu0 %v142_v15  ;;  %v140_v25 = vsel %vm132_vm8, %v362_v46, 0.0 }
  0xb7   :  { %v160_v26 = vsel %vm27_vm0, %v140_v25, 0.0 }
  0xb8   :  { %v125_v18 = vpop.permute.xlu1 %124 }
  0xb9   :  { %vm133_vm7 = vcmp.eq.s32.totalorder %v101_v60, %v125_v18  ;;  %158 = vadd.xlane.f32.xlu1 %v157_v19 }
  0xba   :  { %149 = vadd.xlane.f32.xlu0 %v148_v20  ;;  %v141_v21 = vsel %vm133_vm7, %v360_v45, 0.0 }
  0xbb   :  { %v163_v23 = vsel %vm27_vm0, %v141_v21, 0.0 }
  0xbd   :  { %164 = vadd.xlane.f32.xlu1 %v163_v23 }
  0xbe   :  { %155 = vadd.xlane.f32.xlu0 %v154_v24 }
  0xc2   :  { %161 = vadd.xlane.f32.xlu0 %v160_v26 }
 0x12e   :  { %v78_v27 = vpop.xlane.xlu1 %77 }
 0x12f   :  { %257 = vlog2.f32 %v78_v27 }
 0x132   :  { %v87_v28 = vpop.xlane.xlu1 %86 }
 0x133   :  { %v81_v29 = vpop.xlane.xlu0 %80  ;;  %259 = vlog2.f32 %v87_v28 }
 0x134   :  { %261 = vlog2.f32 %v81_v29 }
 0x136   :  { %v93_v30 = vpop.xlane.xlu1 %92 }
 0x137   :  { %v84_v31 = vpop.xlane.xlu0 %83  ;;  %263 = vlog2.f32 %v93_v30 }
 0x138   :  { %265 = vlog2.f32 %v84_v31 }
 0x139   :  { %v258_v34 = vpop.eup %257 }
 0x13a   :  { %v99_v32 = vpop.xlane.xlu1 %98  ;;  %v167_v43 = vmul.f32 0.6931472, %v258_v34 }
 0x13b   :  { %v90_v33 = vpop.xlane.xlu0 %89  ;;  %267 = vlog2.f32 %v99_v32 }
 0x13c   :  { %269 = vlog2.f32 %v90_v33 }
 0x13d   :  { %v260_v35 = vpop.eup %259 }
 0x13e   :  { %v262_v36 = vpop.eup %261  ;;  %v147_v37 = vpop.xlane.xlu1 %146  ;;  %v173_v40 = vmul.f32 0.6931472, %v260_v35 }
 0x13f   :  { %v96_v38 = vpop.xlane.xlu0 %95  ;;  %v169_v39 = vmul.f32 0.6931472, %v262_v36 }
 0x140   :  { %271 = vlog2.f32 %v96_v38 }
 0x141   :  { %v264_v41 = vpop.eup %263  ;;  %v183_v42 = vsub.f32 %v169_v39, %v147_v37 }
 0x142   :  { %v266_v44 = vpop.eup %265  ;;  %v153_v45 = vpop.xlane.xlu1 %152  ;;  %v177_v49 = vmul.f32 0.6931472, %v264_v41 }
 0x143   :  { %v144_v46 = vpop.xlane.xlu0 %143  ;;  %227 = vst.msk [vmem:[%s423_s2 + $0x8] sm:$0xff] %vm225_vm9, %v183_v42  ;;  %v185_v47 = vsub.f32 %v173_v40, %v153_v45  ;;  %v171_v51 = vmul.f32 0.6931472, %v266_v44 }
 0x144   :  { %v182_v48 = vsub.f32 %v167_v43, %v144_v46 }
 0x145   :  { %v268_v50 = vpop.eup %267  ;;  %229 = vst.msk [vmem:[%s423_s2 + $0x18] sm:$0xff] %vm225_vm9, %v185_v47 }
 0x146   :  { %226 = vst.msk [vmem:[%s423_s2] sm:$0xff] %vm225_vm9, %v182_v48  ;;  %v270_v52 = vpop.eup %269  ;;  %v159_v53 = vpop.xlane.xlu1 %158  ;;  %v181_v57 = vmul.f32 0.6931472, %v268_v50 }
 0x147   :  { %v150_v54 = vpop.xlane.xlu0 %149  ;;  %v187_v55 = vsub.f32 %v177_v49, %v159_v53  ;;  %v175_v58 = vmul.f32 0.6931472, %v270_v52 }
 0x148   :  { %v184_v56 = vsub.f32 %v171_v51, %v150_v54 }
 0x149   :  { %231 = vst.msk [vmem:[%s423_s2 + $0x28] sm:$0xff] %vm225_vm9, %v187_v55 }
 0x14a   :  { %228 = vst.msk [vmem:[%s423_s2 + $0x10] sm:$0xff] %vm225_vm9, %v184_v56  ;;  %v272_v59 = vpop.eup %271  ;;  %v165_v60 = vpop.xlane.xlu1 %164 }
 0x14b   :  { %v156_v61 = vpop.xlane.xlu0 %155  ;;  %v189_v62 = vsub.f32 %v181_v57, %v165_v60  ;;  %v179_v0 = vmul.f32 0.6931472, %v272_v59 }
 0x14c   :  { %v186_v63 = vsub.f32 %v175_v58, %v156_v61 }
 0x14d   :  { %233 = vst.msk [vmem:[%s423_s2 + $0x38] sm:$0xff] %vm225_vm9, %v189_v62 }
 0x14e   :  { %230 = vst.msk [vmem:[%s423_s2 + $0x20] sm:$0xff] %vm225_vm9, %v186_v63 }
 0x14f   :  { %v162_v1 = vpop.xlane.xlu0 %161 }
 0x150   :  { %v188_v2 = vsub.f32 %v179_v0, %v162_v1 }
 0x152   :  { %232 = vst.msk [vmem:[%s423_s2 + $0x30] sm:$0xff] %vm225_vm9, %v188_v2 }

</bundles_post_ra>
